<compile_context>
chip_gen: v5e
topology: v5e:2x2
jax: 0.10.0
libtpu: 0.0.40
codegen_flags: <defaults>
</compile_context>

<pallas_src>
import math

import jax
import jax.numpy as jnp
from jax.experimental import pallas as pl
from jax.experimental.pallas import tpu as pltpu

LANES = 128
EPS = 1e-4
LOG_EPS = math.log(EPS)            # log(1e-4)
LOG_1MEPS = math.log(1.0 - EPS)    # log(1 - 1e-4)


def _vmem_capacity_bytes():
    try:
        return int(pltpu.get_tpu_info().vmem_capacity_bytes)
    except Exception:
        return 64 * 2**20          # v7x per-core; conservative for v5e/v6e


def _fold8(x):
    """Fold a (TM, L) tile to (8, L) per-lane partial sums with pure VPU adds
    (sublane-aligned static slices, no cross-sublane XLU work)."""
    tm = x.shape[0]
    s = x[0:8, :]
    for k in range(1, tm // 8):
        s = s + x[8 * k:8 * (k + 1), :]
    return s


def _write_scalars(out_ref, scalars):
    """Write scalars into lanes 0..k-1 of a (1, 128) lane-dense output row."""
    lane = jax.lax.broadcasted_iota(jnp.int32, (1, LANES), 1)
    row = jnp.zeros((1, LANES), jnp.float32)
    for i, s in enumerate(scalars):
        row = row + jnp.where(lane == i, s.astype(jnp.float32), 0.0)
    out_ref[...] = row


# ---------------------------------------------------------------------------
# Focal (heatmap) loss: one fused, tiled, grid-accumulating kernel.
# Inputs are the 3 gts + 3*nstack raw-logit predictions, each (R, L); no stack
# copies, each HBM tile read exactly once.
# ---------------------------------------------------------------------------
def _make_focal_kernel(nstack, n_rows, tm, tiles_per_half, need_mask):
    n_preds = 3 * nstack

    def kernel(*refs):
        gt_refs = refs[0:3]
        pred_refs = refs[3:3 + n_preds]
        out_ref = refs[3 + n_preds]
        acc_refs = refs[4 + n_preds: 4 + 2 * n_preds]     # combined pos+neg sums
        np_refs = refs[4 + 2 * n_preds: 7 + 2 * n_preds]  # num_pos per heat type

        p_idx = pl.program_id(0)
        i = pl.program_id(1)

        @pl.when(i == 0)
        def _init():
            for a in acc_refs:
                a[...] = jnp.zeros_like(a)
            for a in np_refs:
                a[...] = jnp.zeros_like(a)

        if need_mask:
            row0 = (p_idx * tiles_per_half + i) * tm
            rows = row0 + jax.lax.broadcasted_iota(jnp.int32, (tm, 1), 0)
            valid = (rows < n_rows).astype(jnp.float32)
        else:
            valid = None

        for h in range(3):
            gt = gt_refs[h][...].astype(jnp.float32)          # (TM, L)
            pos = (gt == 1.0).astype(jnp.float32)
            neg_w = jnp.square(jnp.square(1.0 - gt))          # (1-gt)^4; 0 at gt==1
            if valid is not None:
                pos = pos * valid
                neg_w = neg_w * valid
            np_refs[h][...] += _fold8(pos)

            for s in range(nstack):
                x = pred_refs[h * nstack + s][...].astype(jnp.float32)
                # Fused sigmoid + clamp + logs (overflow-safe):
                #   t = exp(-|x|); sigmoid = 1/(1+t) (x>=0) or t/(1+t) (x<0)
                #   log sigmoid    = -(max(-x,0) + log(1+t))
                #   log(1-sigmoid) = -(max( x,0) + log(1+t))
                # clamp p in [eps, 1-eps]  <=>  clamp logs in [log eps, log(1-eps)].
                t = jnp.exp(-jnp.abs(x))
                inv = 1.0 / (1.0 + t)
                p = jnp.where(x >= 0.0, inv, t * inv)
                p = jnp.clip(p, EPS, 1.0 - EPS)
                lse = jnp.log(1.0 + t)
                log_p = jnp.clip(-(jnp.maximum(-x, 0.0) + lse), LOG_EPS, LOG_1MEPS)
                log_1mp = jnp.clip(-(jnp.maximum(x, 0.0) + lse), LOG_EPS, LOG_1MEPS)
                one_m_p = 1.0 - p
                term = (log_p * (one_m_p * one_m_p) * pos
                        + log_1mp * (p * p) * neg_w)
                acc_refs[h * nstack + s][...] += _fold8(term)

        @pl.when(i == pl.num_programs(1) - 1)
        def _finalize():
            lane = jax.lax.broadcasted_iota(jnp.int32, (8, LANES), 1)
            row = jnp.zeros((8, LANES), jnp.float32)
            for idx in range(n_preds):
                row = row + jnp.where(lane == idx, jnp.sum(acc_refs[idx][...]), 0.0)
            for h in range(3):
                row = row + jnp.where(lane == n_preds + h,
                                      jnp.sum(np_refs[h][...]), 0.0)
            out_ref[...] = row.reshape(1, 8, LANES)

    return kernel


def _plan_focal_tiling(n_rows, n_lanes, n_inputs):
    """Pick (halves NP, row-tile TM, tiles_per_half, padded rows) from the
    actual VMEM capacity of the current TPU generation."""
    cap = _vmem_capacity_bytes()
    budget = int(0.55 * cap)
    row_bytes = n_lanes * 4
    acc_bytes = n_inputs * 8 * row_bytes                  # (8, L) f32 accumulators
    avail = budget - acc_bytes - (2 << 20)
    max_tm = avail // (2 * n_inputs * row_bytes)          # double-buffered inputs
    max_tm = max(8, (max_tm // 8) * 8)
    # TODO(synk): if even TM=8 overflows VMEM (enormous H*W), tile the lane axis too.

    np_halves = 2 if n_rows >= 16 else 1                  # keep v7x's 2nd TC busy
    half_rows8 = -(-(-(-n_rows // np_halves)) // 8) * 8   # cdiv(cdiv) rounded to 8
    tm_cap = max(8, min(max_tm, half_rows8))

    tm = None
    cand = tm_cap
    while cand >= 8:
        if n_rows % (np_halves * cand) == 0:
            tm = cand
            break
        cand -= 8
    if tm is None:
        tm = tm_cap                                       # masked tail tile
    tiles_per_half = -(-n_rows // (np_halves * tm))
    rows_pad = np_halves * tm * tiles_per_half
    return np_halves, tm, tiles_per_half, rows_pad


def _fused_focal(gts, preds, nstack):
    """gts: list of 3 (R, L) heat targets; preds: list of 3*nstack (R, L) raw
    logits ordered [tl stacks..., br stacks..., ct stacks...].  Returns the
    scalar focal loss (already normalized / sign-flipped per the reference)."""
    n_rows, n_lanes = gts[0].shape
    n_preds = 3 * nstack
    n_inputs = n_preds + 3

    np_halves, tm, tiles_per_half, rows_pad = _plan_focal_tiling(
        n_rows, n_lanes, n_inputs)
    need_mask = rows_pad != n_rows
    if need_mask:
        # TODO(synk): padding copies the heatmaps once; prefer B*C divisible by 8.
        pad = rows_pad - n_rows
        gts = [jnp.pad(g, ((0, pad), (0, 0))) for g in gts]
        preds = [jnp.pad(x, ((0, pad), (0, 0))) for x in preds]

    idx_map = lambda p, i: (p * tiles_per_half + i, 0)
    in_specs = [pl.BlockSpec((tm, n_lanes), idx_map) for _ in range(n_inputs)]

    cap = _vmem_capacity_bytes()
    tile_bytes = tm * n_lanes * 4
    need = (2 * n_inputs * tile_bytes
            + n_inputs * 8 * n_lanes * 4
            + 2 * np_halves * 8 * LANES * 4
            + (4 << 20))
    vmem_limit = int(min(int(0.92 * cap), max(need, 16 << 20)))

    kernel = _make_focal_kernel(nstack, n_rows, tm, tiles_per_half, need_mask)

    out = pl.pallas_call(
        kernel,
        out_shape=jax.ShapeDtypeStruct((np_halves, 8, LANES), jnp.float32),
        grid_spec=pltpu.PrefetchScalarGridSpec(
            num_scalar_prefetch=0,
            grid=(np_halves, tiles_per_half),
            in_specs=in_specs,
            out_specs=pl.BlockSpec((1, 8, LANES), lambda p, i: (p, 0, 0)),
            scratch_shapes=[pltpu.VMEM((8, n_lanes), jnp.float32)
                            for _ in range(n_inputs)],
        ),
        compiler_params=pltpu.CompilerParams(
            dimension_semantics=("parallel", "arbitrary"),
            vmem_limit_bytes=vmem_limit,
        ),
        cost_estimate=pl.CostEstimate(
            flops=int((20 * n_preds + 8 * 3) * rows_pad * n_lanes),
            transcendentals=int(2 * n_preds * rows_pad * n_lanes),
            bytes_accessed=int(4 * (n_inputs * rows_pad * n_lanes
                                    + np_halves * 8 * LANES)),
        ),
    )(*gts, *preds)

    row = jnp.sum(out[:, 0, :], axis=0)                 # sum the per-half partials
    sums = row[:n_preds].reshape(3, nstack)             # pos+neg sums per (heat, stack)
    np_h = row[n_preds:n_preds + 3]                     # num_pos per heat type
    # loss -= (pos+neg)/num_pos when num_pos>0 else loss -= neg  (pos sum is 0 there)
    scale = jnp.where(np_h > 0.0, 1.0 / jnp.maximum(np_h, 1.0), 1.0)
    return -jnp.sum(sums * scale[:, None])


# ---------------------------------------------------------------------------
# AE pull/push + smooth-L1 regression: one fused whole-array-resident kernel
# (a few KB of data; launch-overhead bound — left structurally as-is).
# ---------------------------------------------------------------------------
def _ae_regr_kernel(tags_ref, regrs_ref, gt_regrs_ref, mask_ref, out_ref):
    nstack = tags_ref.shape[0] // 2
    m = mask_ref[...].astype(jnp.float32)                 # (B, M) 0/1
    num_b = jnp.sum(m, axis=1, keepdims=True)             # (B, 1) objects / batch
    num_all = jnp.sum(m)                                  # total objects (pre-expand)

    inv_num_b = 1.0 / (num_b + EPS)
    mask2 = m[:, :, None] * m[:, None, :]                 # (B, M, M) both valid
    num3 = num_b[:, :, None]                              # (B, 1, 1)
    inv_num3 = 1.0 / (num3 + EPS)
    inv_num2 = 1.0 / ((num3 - 1.0) * num3 + EPS)
    inv_num_all = 1.0 / (num_all + EPS)
    m3 = m[:, :, None]                                    # (B, M, 1)

    pull = jnp.float32(0.0)
    push = jnp.float32(0.0)
    regr = jnp.float32(0.0)
    # TODO(synk): switch to lax.fori_loop if nstack grows beyond ~4 (vreg pressure).
    for s in range(nstack):                               # static unroll (nstack small)
        t0 = tags_ref[2 * s].astype(jnp.float32)          # (B, M)
        t1 = tags_ref[2 * s + 1].astype(jnp.float32)
        tmean = (t0 + t1) * 0.5
        pull = pull + jnp.sum(
            (jnp.square(t0 - tmean) + jnp.square(t1 - tmean)) * inv_num_b * m)
        dist = tmean[:, None, :] - tmean[:, :, None]      # (B, M, M)
        dist = jnp.maximum(1.0 - jnp.abs(dist), 0.0)      # relu(1 - |d|)
        dist = (dist - inv_num3) * inv_num2
        push = push + jnp.sum(dist * mask2)
        for r in range(3):                                # tl / br / ct regressions
            rr = regrs_ref[3 * s + r].astype(jnp.float32)  # (B, M, D)
            gg = gt_regrs_ref[r].astype(jnp.float32)
            d = rr - gg
            ad = jnp.abs(d)
            sl1 = jnp.where(ad < 1.0, 0.5 * d * d, ad - 0.5)  # smooth-L1, sum reduction
            regr = regr + jnp.sum(sl1 * m3) * inv_num_all

    _write_scalars(out_ref, [pull, push, regr])


def _ae_regr_call(tags, regrs, gt_regrs, mask_f):
    out = pl.pallas_call(
        _ae_regr_kernel,
        out_shape=jax.ShapeDtypeStruct((1, LANES), jnp.float32),
        in_specs=[pl.BlockSpec(memory_space=pltpu.MemorySpace.VMEM)] * 4,
        out_specs=pl.BlockSpec(memory_space=pltpu.MemorySpace.VMEM),
    )(tags, regrs, gt_regrs, mask_f)
    return out[0]


# ---------------------------------------------------------------------------
# Forward wrapper (mirrors AELoss.forward)
# ---------------------------------------------------------------------------
def ae_loss_forward(outs, targets, pull_weight=1.0, push_weight=1.0, regr_weight=1.0):
    stride = 8
    tl_heats = outs[0::stride]
    br_heats = outs[1::stride]
    ct_heats = outs[2::stride]
    tl_tags = outs[3::stride]
    br_tags = outs[4::stride]
    tl_regrs = outs[5::stride]
    br_regrs = outs[6::stride]
    ct_regrs = outs[7::stride]

    (gt_tl_heat, gt_br_heat, gt_ct_heat, gt_mask,
     gt_tl_regr, gt_br_regr, gt_ct_regr) = targets

    nstack = len(tl_heats)
    B, C, H, W = gt_tl_heat.shape
    R, L = B * C, H * W

    # ---- focal loss: one fused call over 3 heat types x nstack predictions.
    # Reshapes are metadata-only; no stack/copy of the heatmaps.
    gts = [gt_tl_heat.reshape(R, L), gt_br_heat.reshape(R, L),
           gt_ct_heat.reshape(R, L)]
    preds = [h.reshape(R, L) for h in (tl_heats + br_heats + ct_heats)]
    focal = _fused_focal(gts, preds, nstack)

    # ---- AE pull/push + regressions: one fused call over all stacks ----
    tag_list = []
    for tl, br in zip(tl_tags, br_tags):
        tag_list.append(tl.reshape(tl.shape[0], -1))   # (B, M, 1) -> (B, M)
        tag_list.append(br.reshape(br.shape[0], -1))
    tags = jnp.stack(tag_list, axis=0)                 # (2*nstack, B, M)

    regr_list = []
    for a, b, c in zip(tl_regrs, br_regrs, ct_regrs):
        regr_list += [a, b, c]
    regrs = jnp.stack(regr_list, axis=0)               # (3*nstack, B, M, D)
    gt_regrs = jnp.stack([gt_tl_regr, gt_br_regr, gt_ct_regr], axis=0)  # (3, B, M, D)

    mask_f = gt_mask.astype(jnp.float32)
    row = _ae_regr_call(tags, regrs, gt_regrs, mask_f)
    pull = pull_weight * row[0]
    push = push_weight * row[1]
    regr = regr_weight * row[2]

    loss = (focal + pull + push + regr) / nstack
    return (
        jnp.reshape(loss, (1,)),
        jnp.reshape(focal / nstack, (1,)),
        jnp.reshape(pull / nstack, (1,)),
        jnp.reshape(push / nstack, (1,)),
        jnp.reshape(regr / nstack, (1,)),
    )


if __name__ == "__main__":
    key = jax.random.PRNGKey(0)
    B, C, H, W = 2, 4, 16, 16     # batch, heat channels, spatial
    M, D = 8, 2                   # max objects, regr dims

    keys = jax.random.split(key, 16)

    # model outputs: [tl_heat, br_heat, ct_heat, tl_tag, br_tag, tl_regr, br_regr, ct_regr]
    tl_heat = jax.random.normal(keys[0], (B, C, H, W), jnp.float32)
    br_heat = jax.random.normal(keys[1], (B, C, H, W), jnp.float32)
    ct_heat = jax.random.normal(keys[2], (B, C, H, W), jnp.float32)
    tl_tag = jax.random.normal(keys[3], (B, M, 1), jnp.float32)
    br_tag = jax.random.normal(keys[4], (B, M, 1), jnp.float32)
    tl_regr = jax.random.normal(keys[5], (B, M, D), jnp.float32)
    br_regr = jax.random.normal(keys[6], (B, M, D), jnp.float32)
    ct_regr = jax.random.normal(keys[7], (B, M, D), jnp.float32)
    outs = [tl_heat, br_heat, ct_heat, tl_tag, br_tag, tl_regr, br_regr, ct_regr]

    # targets: gaussian-ish heatmaps in [0,1) with a few exact 1.0 peaks
    def make_gt_heat(k):
        g = jax.random.uniform(k, (B, C, H, W), jnp.float32, 0.0, 0.95)
        g = g.at[:, :, 3, 5].set(1.0)
        g = g.at[:, :, 9, 12].set(1.0)
        return g

    gt_tl_heat = make_gt_heat(keys[8])
    gt_br_heat = make_gt_heat(keys[9])
    gt_ct_heat = make_gt_heat(keys[10])
    # object validity mask: 5 objects in batch 0, 3 in batch 1
    gt_mask = jnp.array(
        [[1, 1, 1, 1, 1, 0, 0, 0],
         [1, 1, 1, 0, 0, 0, 0, 0]], dtype=jnp.float32)
    gt_tl_regr = jax.random.uniform(keys[11], (B, M, D), jnp.float32)
    gt_br_regr = jax.random.uniform(keys[12], (B, M, D), jnp.float32)
    gt_ct_regr = jax.random.uniform(keys[13], (B, M, D), jnp.float32)

    targets = [gt_tl_heat, gt_br_heat, gt_ct_heat, gt_mask,
               gt_tl_regr, gt_br_regr, gt_ct_regr]

    loss, focal, pull, push, regr = ae_loss_forward(outs, targets)
    jax.block_until_ready(loss)
    jax.block_until_ready(focal)
    jax.block_until_ready(pull)
    jax.block_until_ready(push)
    jax.block_until_ready(regr)
    print("KERNEL_OK")
</pallas_src>

<mosaic_0001>
module attributes {stable_mosaic.version = 11 : i64} {
  func.func @kernel(%arg0: i32, %arg1: i32, %arg2: memref<8x256xf32, #tpu.memory_space<vmem>>, %arg3: memref<8x256xf32, #tpu.memory_space<vmem>>, %arg4: memref<8x256xf32, #tpu.memory_space<vmem>>, %arg5: memref<8x256xf32, #tpu.memory_space<vmem>>, %arg6: memref<8x256xf32, #tpu.memory_space<vmem>>, %arg7: memref<8x256xf32, #tpu.memory_space<vmem>>, %arg8: memref<1x8x128xf32, #tpu.memory_space<vmem>>, %arg9: memref<8x256xf32, #tpu.memory_space<vmem>>, %arg10: memref<8x256xf32, #tpu.memory_space<vmem>>, %arg11: memref<8x256xf32, #tpu.memory_space<vmem>>, %arg12: memref<8x256xf32, #tpu.memory_space<vmem>>, %arg13: memref<8x256xf32, #tpu.memory_space<vmem>>, %arg14: memref<8x256xf32, #tpu.memory_space<vmem>>) attributes {dimension_semantics = [#tpu.dimension_semantics<parallel>, #tpu.dimension_semantics<arbitrary>], iteration_bounds = array<i64: 1, 1>, scalar_prefetch = 0 : i64, scratch_operands = 6 : i64, tpu.core_type = #tpu.core_type<tc>, window_params = [{transform_indices = @transform_0, window_bounds = array<i64: 8, 256>}, {transform_indices = @transform_1, window_bounds = array<i64: 8, 256>}, {transform_indices = @transform_2, window_bounds = array<i64: 8, 256>}, {transform_indices = @transform_3, window_bounds = array<i64: 8, 256>}, {transform_indices = @transform_4, window_bounds = array<i64: 8, 256>}, {transform_indices = @transform_5, window_bounds = array<i64: 8, 256>}, {transform_indices = @transform_6, window_bounds = array<i64: 1, 8, 128>}]} {
    %c0_i32 = arith.constant 0 : i32
    %0 = arith.cmpi eq, %arg1, %c0_i32 : i32
    %1 = arith.extui %0 : i1 to i32
    %c0_i32_0 = arith.constant 0 : i32
    %2 = arith.cmpi ne, %1, %c0_i32_0 : i32
    scf.if %2 {
      %cst_94 = arith.constant 0.000000e+00 : f32
      %198 = vector.broadcast %cst_94 : f32 to vector<8x256xf32>
      %c0_95 = arith.constant 0 : index
      %c0_96 = arith.constant 0 : index
      %199 = vector.load %arg9[%c0_95, %c0_96] : memref<8x256xf32, #tpu.memory_space<vmem>>, vector<8x256xf32>
      tpu.vector_store %arg9[%c0_95, %c0_96], %198 {strides = array<i32>} : memref<8x256xf32, #tpu.memory_space<vmem>>, vector<8x256xf32>,
      %cst_97 = arith.constant 0.000000e+00 : f32
      %200 = vector.broadcast %cst_97 : f32 to vector<8x256xf32>
      %c0_98 = arith.constant 0 : index
      %c0_99 = arith.constant 0 : index
      %201 = vector.load %arg10[%c0_98, %c0_99] : memref<8x256xf32, #tpu.memory_space<vmem>>, vector<8x256xf32>
      tpu.vector_store %arg10[%c0_98, %c0_99], %200 {strides = array<i32>} : memref<8x256xf32, #tpu.memory_space<vmem>>, vector<8x256xf32>,
      %cst_100 = arith.constant 0.000000e+00 : f32
      %202 = vector.broadcast %cst_100 : f32 to vector<8x256xf32>
      %c0_101 = arith.constant 0 : index
      %c0_102 = arith.constant 0 : index
      %203 = vector.load %arg11[%c0_101, %c0_102] : memref<8x256xf32, #tpu.memory_space<vmem>>, vector<8x256xf32>
      tpu.vector_store %arg11[%c0_101, %c0_102], %202 {strides = array<i32>} : memref<8x256xf32, #tpu.memory_space<vmem>>, vector<8x256xf32>,
      %cst_103 = arith.constant 0.000000e+00 : f32
      %204 = vector.broadcast %cst_103 : f32 to vector<8x256xf32>
      %c0_104 = arith.constant 0 : index
      %c0_105 = arith.constant 0 : index
      %205 = vector.load %arg12[%c0_104, %c0_105] : memref<8x256xf32, #tpu.memory_space<vmem>>, vector<8x256xf32>
      tpu.vector_store %arg12[%c0_104, %c0_105], %204 {strides = array<i32>} : memref<8x256xf32, #tpu.memory_space<vmem>>, vector<8x256xf32>,
      %cst_106 = arith.constant 0.000000e+00 : f32
      %206 = vector.broadcast %cst_106 : f32 to vector<8x256xf32>
      %c0_107 = arith.constant 0 : index
      %c0_108 = arith.constant 0 : index
      %207 = vector.load %arg13[%c0_107, %c0_108] : memref<8x256xf32, #tpu.memory_space<vmem>>, vector<8x256xf32>
      tpu.vector_store %arg13[%c0_107, %c0_108], %206 {strides = array<i32>} : memref<8x256xf32, #tpu.memory_space<vmem>>, vector<8x256xf32>,
      %cst_109 = arith.constant 0.000000e+00 : f32
      %208 = vector.broadcast %cst_109 : f32 to vector<8x256xf32>
      %c0_110 = arith.constant 0 : index
      %c0_111 = arith.constant 0 : index
      %209 = vector.load %arg14[%c0_110, %c0_111] : memref<8x256xf32, #tpu.memory_space<vmem>>, vector<8x256xf32>
      tpu.vector_store %arg14[%c0_110, %c0_111], %208 {strides = array<i32>} : memref<8x256xf32, #tpu.memory_space<vmem>>, vector<8x256xf32>,
    } else {
    }
    %c0 = arith.constant 0 : index
    %c0_1 = arith.constant 0 : index
    %3 = vector.load %arg2[%c0, %c0_1] : memref<8x256xf32, #tpu.memory_space<vmem>>, vector<8x256xf32>
    %cst = arith.constant 1.000000e+00 : f32
    %4 = vector.broadcast %cst : f32 to vector<8x256xf32>
    %5 = arith.cmpf oeq, %3, %4 : vector<8x256xf32>
    %6 = arith.extui %5 : vector<8x256xi1> to vector<8x256xi32>
    %7 = arith.sitofp %6 : vector<8x256xi32> to vector<8x256xf32>
    %cst_2 = arith.constant 1.000000e+00 : f32
    %8 = vector.broadcast %cst_2 : f32 to vector<8x256xf32>
    %9 = arith.subf %8, %3 : vector<8x256xf32>
    %10 = arith.mulf %9, %9 : vector<8x256xf32>
    %11 = arith.mulf %10, %10 : vector<8x256xf32>
    %c0_3 = arith.constant 0 : index
    %c0_4 = arith.constant 0 : index
    %12 = vector.load %arg12[%c0_3, %c0_4] : memref<8x256xf32, #tpu.memory_space<vmem>>, vector<8x256xf32>
    %13 = arith.addf %12, %7 : vector<8x256xf32>
    %c0_5 = arith.constant 0 : index
    %c0_6 = arith.constant 0 : index
    %14 = vector.load %arg12[%c0_5, %c0_6] : memref<8x256xf32, #tpu.memory_space<vmem>>, vector<8x256xf32>
    tpu.vector_store %arg12[%c0_5, %c0_6], %13 {strides = array<i32>} : memref<8x256xf32, #tpu.memory_space<vmem>>, vector<8x256xf32>,
    %c0_7 = arith.constant 0 : index
    %c0_8 = arith.constant 0 : index
    %15 = vector.load %arg5[%c0_7, %c0_8] : memref<8x256xf32, #tpu.memory_space<vmem>>, vector<8x256xf32>
    %16 = math.absf %15 : vector<8x256xf32>
    %cst_9 = arith.constant 0.000000e+00 : f32
    %17 = vector.broadcast %cst_9 : f32 to vector<8x256xf32>
    %18 = arith.subf %17, %16 : vector<8x256xf32>
    %19 = math.exp %18 : vector<8x256xf32>
    %cst_10 = arith.constant 1.000000e+00 : f32
    %20 = vector.broadcast %cst_10 : f32 to vector<8x256xf32>
    %21 = arith.addf %20, %19 : vector<8x256xf32>
    %cst_11 = arith.constant 1.000000e+00 : f32
    %22 = vector.broadcast %cst_11 : f32 to vector<8x256xf32>
    %23 = arith.divf %22, %21 : vector<8x256xf32>
    %cst_12 = arith.constant 0.000000e+00 : f32
    %24 = vector.broadcast %cst_12 : f32 to vector<8x256xf32>
    %25 = arith.cmpf oge, %15, %24 : vector<8x256xf32>
    %26 = arith.mulf %19, %23 : vector<8x256xf32>
    %27 = arith.select %25, %23, %26 : vector<8x256xi1>, vector<8x256xf32>
    %cst_13 = arith.constant 9.99999974E-5 : f32
    %cst_14 = arith.constant 0.999899983 : f32
    %28 = vector.broadcast %cst_13 : f32 to vector<8x256xf32>
    %29 = arith.maximumf %28, %27 : vector<8x256xf32>
    %30 = vector.broadcast %cst_14 : f32 to vector<8x256xf32>
    %31 = arith.minimumf %30, %29 : vector<8x256xf32>
    %cst_15 = arith.constant 1.000000e+00 : f32
    %32 = vector.broadcast %cst_15 : f32 to vector<8x256xf32>
    %33 = arith.addf %32, %19 : vector<8x256xf32>
    %34 = math.log %33 : vector<8x256xf32>
    %cst_16 = arith.constant 0.000000e+00 : f32
    %35 = vector.broadcast %cst_16 : f32 to vector<8x256xf32>
    %36 = arith.subf %35, %15 : vector<8x256xf32>
    %cst_17 = arith.constant 0.000000e+00 : f32
    %37 = vector.broadcast %cst_17 : f32 to vector<8x256xf32>
    %38 = arith.maximumf %36, %37 : vector<8x256xf32>
    %39 = arith.addf %38, %34 : vector<8x256xf32>
    %cst_18 = arith.constant 0.000000e+00 : f32
    %40 = vector.broadcast %cst_18 : f32 to vector<8x256xf32>
    %41 = arith.subf %40, %39 : vector<8x256xf32>
    %cst_19 = arith.constant -9.21034049 : f32
    %cst_20 = arith.constant -1.000050e-04 : f32
    %42 = vector.broadcast %cst_19 : f32 to vector<8x256xf32>
    %43 = arith.maximumf %42, %41 : vector<8x256xf32>
    %44 = vector.broadcast %cst_20 : f32 to vector<8x256xf32>
    %45 = arith.minimumf %44, %43 : vector<8x256xf32>
    %cst_21 = arith.constant 0.000000e+00 : f32
    %46 = vector.broadcast %cst_21 : f32 to vector<8x256xf32>
    %47 = arith.maximumf %15, %46 : vector<8x256xf32>
    %48 = arith.addf %47, %34 : vector<8x256xf32>
    %cst_22 = arith.constant 0.000000e+00 : f32
    %49 = vector.broadcast %cst_22 : f32 to vector<8x256xf32>
    %50 = arith.subf %49, %48 : vector<8x256xf32>
    %cst_23 = arith.constant -9.21034049 : f32
    %cst_24 = arith.constant -1.000050e-04 : f32
    %51 = vector.broadcast %cst_23 : f32 to vector<8x256xf32>
    %52 = arith.maximumf %51, %50 : vector<8x256xf32>
    %53 = vector.broadcast %cst_24 : f32 to vector<8x256xf32>
    %54 = arith.minimumf %53, %52 : vector<8x256xf32>
    %cst_25 = arith.constant 1.000000e+00 : f32
    %55 = vector.broadcast %cst_25 : f32 to vector<8x256xf32>
    %56 = arith.subf %55, %31 : vector<8x256xf32>
    %57 = arith.mulf %56, %56 : vector<8x256xf32>
    %58 = arith.mulf %45, %57 : vector<8x256xf32>
    %59 = arith.mulf %58, %7 : vector<8x256xf32>
    %60 = arith.mulf %31, %31 : vector<8x256xf32>
    %61 = arith.mulf %54, %60 : vector<8x256xf32>
    %62 = arith.mulf %61, %11 : vector<8x256xf32>
    %63 = arith.addf %59, %62 : vector<8x256xf32>
    %c0_26 = arith.constant 0 : index
    %c0_27 = arith.constant 0 : index
    %64 = vector.load %arg9[%c0_26, %c0_27] : memref<8x256xf32, #tpu.memory_space<vmem>>, vector<8x256xf32>
    %65 = arith.addf %64, %63 : vector<8x256xf32>
    %c0_28 = arith.constant 0 : index
    %c0_29 = arith.constant 0 : index
    %66 = vector.load %arg9[%c0_28, %c0_29] : memref<8x256xf32, #tpu.memory_space<vmem>>, vector<8x256xf32>
    tpu.vector_store %arg9[%c0_28, %c0_29], %65 {strides = array<i32>} : memref<8x256xf32, #tpu.memory_space<vmem>>, vector<8x256xf32>,
    %c0_30 = arith.constant 0 : index
    %c0_31 = arith.constant 0 : index
    %67 = vector.load %arg3[%c0_30, %c0_31] : memref<8x256xf32, #tpu.memory_space<vmem>>, vector<8x256xf32>
    %cst_32 = arith.constant 1.000000e+00 : f32
    %68 = vector.broadcast %cst_32 : f32 to vector<8x256xf32>
    %69 = arith.cmpf oeq, %67, %68 : vector<8x256xf32>
    %70 = arith.extui %69 : vector<8x256xi1> to vector<8x256xi32>
    %71 = arith.sitofp %70 : vector<8x256xi32> to vector<8x256xf32>
    %cst_33 = arith.constant 1.000000e+00 : f32
    %72 = vector.broadcast %cst_33 : f32 to vector<8x256xf32>
    %73 = arith.subf %72, %67 : vector<8x256xf32>
    %74 = arith.mulf %73, %73 : vector<8x256xf32>
    %75 = arith.mulf %74, %74 : vector<8x256xf32>
    %c0_34 = arith.constant 0 : index
    %c0_35 = arith.constant 0 : index
    %76 = vector.load %arg13[%c0_34, %c0_35] : memref<8x256xf32, #tpu.memory_space<vmem>>, vector<8x256xf32>
    %77 = arith.addf %76, %71 : vector<8x256xf32>
    %c0_36 = arith.constant 0 : index
    %c0_37 = arith.constant 0 : index
    %78 = vector.load %arg13[%c0_36, %c0_37] : memref<8x256xf32, #tpu.memory_space<vmem>>, vector<8x256xf32>
    tpu.vector_store %arg13[%c0_36, %c0_37], %77 {strides = array<i32>} : memref<8x256xf32, #tpu.memory_space<vmem>>, vector<8x256xf32>,
    %c0_38 = arith.constant 0 : index
    %c0_39 = arith.constant 0 : index
    %79 = vector.load %arg6[%c0_38, %c0_39] : memref<8x256xf32, #tpu.memory_space<vmem>>, vector<8x256xf32>
    %80 = math.absf %79 : vector<8x256xf32>
    %cst_40 = arith.constant 0.000000e+00 : f32
    %81 = vector.broadcast %cst_40 : f32 to vector<8x256xf32>
    %82 = arith.subf %81, %80 : vector<8x256xf32>
    %83 = math.exp %82 : vector<8x256xf32>
    %cst_41 = arith.constant 1.000000e+00 : f32
    %84 = vector.broadcast %cst_41 : f32 to vector<8x256xf32>
    %85 = arith.addf %84, %83 : vector<8x256xf32>
    %cst_42 = arith.constant 1.000000e+00 : f32
    %86 = vector.broadcast %cst_42 : f32 to vector<8x256xf32>
    %87 = arith.divf %86, %85 : vector<8x256xf32>
    %cst_43 = arith.constant 0.000000e+00 : f32
    %88 = vector.broadcast %cst_43 : f32 to vector<8x256xf32>
    %89 = arith.cmpf oge, %79, %88 : vector<8x256xf32>
    %90 = arith.mulf %83, %87 : vector<8x256xf32>
    %91 = arith.select %89, %87, %90 : vector<8x256xi1>, vector<8x256xf32>
    %cst_44 = arith.constant 9.99999974E-5 : f32
    %cst_45 = arith.constant 0.999899983 : f32
    %92 = vector.broadcast %cst_44 : f32 to vector<8x256xf32>
    %93 = arith.maximumf %92, %91 : vector<8x256xf32>
    %94 = vector.broadcast %cst_45 : f32 to vector<8x256xf32>
    %95 = arith.minimumf %94, %93 : vector<8x256xf32>
    %cst_46 = arith.constant 1.000000e+00 : f32
    %96 = vector.broadcast %cst_46 : f32 to vector<8x256xf32>
    %97 = arith.addf %96, %83 : vector<8x256xf32>
    %98 = math.log %97 : vector<8x256xf32>
    %cst_47 = arith.constant 0.000000e+00 : f32
    %99 = vector.broadcast %cst_47 : f32 to vector<8x256xf32>
    %100 = arith.subf %99, %79 : vector<8x256xf32>
    %cst_48 = arith.constant 0.000000e+00 : f32
    %101 = vector.broadcast %cst_48 : f32 to vector<8x256xf32>
    %102 = arith.maximumf %100, %101 : vector<8x256xf32>
    %103 = arith.addf %102, %98 : vector<8x256xf32>
    %cst_49 = arith.constant 0.000000e+00 : f32
    %104 = vector.broadcast %cst_49 : f32 to vector<8x256xf32>
    %105 = arith.subf %104, %103 : vector<8x256xf32>
    %cst_50 = arith.constant -9.21034049 : f32
    %cst_51 = arith.constant -1.000050e-04 : f32
    %106 = vector.broadcast %cst_50 : f32 to vector<8x256xf32>
    %107 = arith.maximumf %106, %105 : vector<8x256xf32>
    %108 = vector.broadcast %cst_51 : f32 to vector<8x256xf32>
    %109 = arith.minimumf %108, %107 : vector<8x256xf32>
    %cst_52 = arith.constant 0.000000e+00 : f32
    %110 = vector.broadcast %cst_52 : f32 to vector<8x256xf32>
    %111 = arith.maximumf %79, %110 : vector<8x256xf32>
    %112 = arith.addf %111, %98 : vector<8x256xf32>
    %cst_53 = arith.constant 0.000000e+00 : f32
    %113 = vector.broadcast %cst_53 : f32 to vector<8x256xf32>
    %114 = arith.subf %113, %112 : vector<8x256xf32>
    %cst_54 = arith.constant -9.21034049 : f32
    %cst_55 = arith.constant -1.000050e-04 : f32
    %115 = vector.broadcast %cst_54 : f32 to vector<8x256xf32>
    %116 = arith.maximumf %115, %114 : vector<8x256xf32>
    %117 = vector.broadcast %cst_55 : f32 to vector<8x256xf32>
    %118 = arith.minimumf %117, %116 : vector<8x256xf32>
    %cst_56 = arith.constant 1.000000e+00 : f32
    %119 = vector.broadcast %cst_56 : f32 to vector<8x256xf32>
    %120 = arith.subf %119, %95 : vector<8x256xf32>
    %121 = arith.mulf %120, %120 : vector<8x256xf32>
    %122 = arith.mulf %109, %121 : vector<8x256xf32>
    %123 = arith.mulf %122, %71 : vector<8x256xf32>
    %124 = arith.mulf %95, %95 : vector<8x256xf32>
    %125 = arith.mulf %118, %124 : vector<8x256xf32>
    %126 = arith.mulf %125, %75 : vector<8x256xf32>
    %127 = arith.addf %123, %126 : vector<8x256xf32>
    %c0_57 = arith.constant 0 : index
    %c0_58 = arith.constant 0 : index
    %128 = vector.load %arg10[%c0_57, %c0_58] : memref<8x256xf32, #tpu.memory_space<vmem>>, vector<8x256xf32>
    %129 = arith.addf %128, %127 : vector<8x256xf32>
    %c0_59 = arith.constant 0 : index
    %c0_60 = arith.constant 0 : index
    %130 = vector.load %arg10[%c0_59, %c0_60] : memref<8x256xf32, #tpu.memory_space<vmem>>, vector<8x256xf32>
    tpu.vector_store %arg10[%c0_59, %c0_60], %129 {strides = array<i32>} : memref<8x256xf32, #tpu.memory_space<vmem>>, vector<8x256xf32>,
    %c0_61 = arith.constant 0 : index
    %c0_62 = arith.constant 0 : index
    %131 = vector.load %arg4[%c0_61, %c0_62] : memref<8x256xf32, #tpu.memory_space<vmem>>, vector<8x256xf32>
    %cst_63 = arith.constant 1.000000e+00 : f32
    %132 = vector.broadcast %cst_63 : f32 to vector<8x256xf32>
    %133 = arith.cmpf oeq, %131, %132 : vector<8x256xf32>
    %134 = arith.extui %133 : vector<8x256xi1> to vector<8x256xi32>
    %135 = arith.sitofp %134 : vector<8x256xi32> to vector<8x256xf32>
    %cst_64 = arith.constant 1.000000e+00 : f32
    %136 = vector.broadcast %cst_64 : f32 to vector<8x256xf32>
    %137 = arith.subf %136, %131 : vector<8x256xf32>
    %138 = arith.mulf %137, %137 : vector<8x256xf32>
    %139 = arith.mulf %138, %138 : vector<8x256xf32>
    %c0_65 = arith.constant 0 : index
    %c0_66 = arith.constant 0 : index
    %140 = vector.load %arg14[%c0_65, %c0_66] : memref<8x256xf32, #tpu.memory_space<vmem>>, vector<8x256xf32>
    %141 = arith.addf %140, %135 : vector<8x256xf32>
    %c0_67 = arith.constant 0 : index
    %c0_68 = arith.constant 0 : index
    %142 = vector.load %arg14[%c0_67, %c0_68] : memref<8x256xf32, #tpu.memory_space<vmem>>, vector<8x256xf32>
    tpu.vector_store %arg14[%c0_67, %c0_68], %141 {strides = array<i32>} : memref<8x256xf32, #tpu.memory_space<vmem>>, vector<8x256xf32>,
    %c0_69 = arith.constant 0 : index
    %c0_70 = arith.constant 0 : index
    %143 = vector.load %arg7[%c0_69, %c0_70] : memref<8x256xf32, #tpu.memory_space<vmem>>, vector<8x256xf32>
    %144 = math.absf %143 : vector<8x256xf32>
    %cst_71 = arith.constant 0.000000e+00 : f32
    %145 = vector.broadcast %cst_71 : f32 to vector<8x256xf32>
    %146 = arith.subf %145, %144 : vector<8x256xf32>
    %147 = math.exp %146 : vector<8x256xf32>
    %cst_72 = arith.constant 1.000000e+00 : f32
    %148 = vector.broadcast %cst_72 : f32 to vector<8x256xf32>
    %149 = arith.addf %148, %147 : vector<8x256xf32>
    %cst_73 = arith.constant 1.000000e+00 : f32
    %150 = vector.broadcast %cst_73 : f32 to vector<8x256xf32>
    %151 = arith.divf %150, %149 : vector<8x256xf32>
    %cst_74 = arith.constant 0.000000e+00 : f32
    %152 = vector.broadcast %cst_74 : f32 to vector<8x256xf32>
    %153 = arith.cmpf oge, %143, %152 : vector<8x256xf32>
    %154 = arith.mulf %147, %151 : vector<8x256xf32>
    %155 = arith.select %153, %151, %154 : vector<8x256xi1>, vector<8x256xf32>
    %cst_75 = arith.constant 9.99999974E-5 : f32
    %cst_76 = arith.constant 0.999899983 : f32
    %156 = vector.broadcast %cst_75 : f32 to vector<8x256xf32>
    %157 = arith.maximumf %156, %155 : vector<8x256xf32>
    %158 = vector.broadcast %cst_76 : f32 to vector<8x256xf32>
    %159 = arith.minimumf %158, %157 : vector<8x256xf32>
    %cst_77 = arith.constant 1.000000e+00 : f32
    %160 = vector.broadcast %cst_77 : f32 to vector<8x256xf32>
    %161 = arith.addf %160, %147 : vector<8x256xf32>
    %162 = math.log %161 : vector<8x256xf32>
    %cst_78 = arith.constant 0.000000e+00 : f32
    %163 = vector.broadcast %cst_78 : f32 to vector<8x256xf32>
    %164 = arith.subf %163, %143 : vector<8x256xf32>
    %cst_79 = arith.constant 0.000000e+00 : f32
    %165 = vector.broadcast %cst_79 : f32 to vector<8x256xf32>
    %166 = arith.maximumf %164, %165 : vector<8x256xf32>
    %167 = arith.addf %166, %162 : vector<8x256xf32>
    %cst_80 = arith.constant 0.000000e+00 : f32
    %168 = vector.broadcast %cst_80 : f32 to vector<8x256xf32>
    %169 = arith.subf %168, %167 : vector<8x256xf32>
    %cst_81 = arith.constant -9.21034049 : f32
    %cst_82 = arith.constant -1.000050e-04 : f32
    %170 = vector.broadcast %cst_81 : f32 to vector<8x256xf32>
    %171 = arith.maximumf %170, %169 : vector<8x256xf32>
    %172 = vector.broadcast %cst_82 : f32 to vector<8x256xf32>
    %173 = arith.minimumf %172, %171 : vector<8x256xf32>
    %cst_83 = arith.constant 0.000000e+00 : f32
    %174 = vector.broadcast %cst_83 : f32 to vector<8x256xf32>
    %175 = arith.maximumf %143, %174 : vector<8x256xf32>
    %176 = arith.addf %175, %162 : vector<8x256xf32>
    %cst_84 = arith.constant 0.000000e+00 : f32
    %177 = vector.broadcast %cst_84 : f32 to vector<8x256xf32>
    %178 = arith.subf %177, %176 : vector<8x256xf32>
    %cst_85 = arith.constant -9.21034049 : f32
    %cst_86 = arith.constant -1.000050e-04 : f32
    %179 = vector.broadcast %cst_85 : f32 to vector<8x256xf32>
    %180 = arith.maximumf %179, %178 : vector<8x256xf32>
    %181 = vector.broadcast %cst_86 : f32 to vector<8x256xf32>
    %182 = arith.minimumf %181, %180 : vector<8x256xf32>
    %cst_87 = arith.constant 1.000000e+00 : f32
    %183 = vector.broadcast %cst_87 : f32 to vector<8x256xf32>
    %184 = arith.subf %183, %159 : vector<8x256xf32>
    %185 = arith.mulf %184, %184 : vector<8x256xf32>
    %186 = arith.mulf %173, %185 : vector<8x256xf32>
    %187 = arith.mulf %186, %135 : vector<8x256xf32>
    %188 = arith.mulf %159, %159 : vector<8x256xf32>
    %189 = arith.mulf %182, %188 : vector<8x256xf32>
    %190 = arith.mulf %189, %139 : vector<8x256xf32>
    %191 = arith.addf %187, %190 : vector<8x256xf32>
    %c0_88 = arith.constant 0 : index
    %c0_89 = arith.constant 0 : index
    %192 = vector.load %arg11[%c0_88, %c0_89] : memref<8x256xf32, #tpu.memory_space<vmem>>, vector<8x256xf32>
    %193 = arith.addf %192, %191 : vector<8x256xf32>
    %c0_90 = arith.constant 0 : index
    %c0_91 = arith.constant 0 : index
    %194 = vector.load %arg11[%c0_90, %c0_91] : memref<8x256xf32, #tpu.memory_space<vmem>>, vector<8x256xf32>
    tpu.vector_store %arg11[%c0_90, %c0_91], %193 {strides = array<i32>} : memref<8x256xf32, #tpu.memory_space<vmem>>, vector<8x256xf32>,
    %c0_i32_92 = arith.constant 0 : i32
    %195 = arith.cmpi eq, %arg1, %c0_i32_92 : i32
    %196 = arith.extui %195 : i1 to i32
    %c0_i32_93 = arith.constant 0 : i32
    %197 = arith.cmpi ne, %196, %c0_i32_93 : i32
    scf.if %197 {
      %198 = tpu.iota {dimensions = array<i32: 1>} : vector<8x128xi32>
      %cst_94 = arith.constant 0.000000e+00 : f32
      %199 = vector.broadcast %cst_94 : f32 to vector<8x128xf32>
      %c0_i32_95 = arith.constant 0 : i32
      %200 = vector.broadcast %c0_i32_95 : i32 to vector<8x128xi32>
      %201 = arith.cmpi eq, %198, %200 : vector<8x128xi32>
      %c0_96 = arith.constant 0 : index
      %c0_97 = arith.constant 0 : index
      %202 = vector.load %arg9[%c0_96, %c0_97] : memref<8x256xf32, #tpu.memory_space<vmem>>, vector<8x256xf32>
      %203 = vector.shape_cast %202 : vector<8x256xf32> to vector<1x8x256xf32>
      %cst_98 = arith.constant dense<0.000000e+00> : vector<1xf32>
      %204 = vector.multi_reduction <add>, %203, %cst_98 [1, 2] : vector<1x8x256xf32> to vector<1xf32>
      %205 = vector.shape_cast %204 : vector<1xf32> to vector<1x1x1xf32>
      %206 = vector.extract %205[0, 0, 0] : f32 from vector<1x1x1xf32>
      %cst_99 = arith.constant 0.000000e+00 : f32
      %207 = vector.broadcast %206 : f32 to vector<8x128xf32>
      %208 = vector.broadcast %cst_99 : f32 to vector<8x128xf32>
      %209 = arith.select %201, %207, %208 : vector<8x128xi1>, vector<8x128xf32>
      %210 = arith.addf %199, %209 : vector<8x128xf32>
      %c1_i32 = arith.constant 1 : i32
      %211 = vector.broadcast %c1_i32 : i32 to vector<8x128xi32>
      %212 = arith.cmpi eq, %198, %211 : vector<8x128xi32>
      %c0_100 = arith.constant 0 : index
      %c0_101 = arith.constant 0 : index
      %213 = vector.load %arg10[%c0_100, %c0_101] : memref<8x256xf32, #tpu.memory_space<vmem>>, vector<8x256xf32>
      %214 = vector.shape_cast %213 : vector<8x256xf32> to vector<1x8x256xf32>
      %cst_102 = arith.constant dense<0.000000e+00> : vector<1xf32>
      %215 = vector.multi_reduction <add>, %214, %cst_102 [1, 2] : vector<1x8x256xf32> to vector<1xf32>
      %216 = vector.shape_cast %215 : vector<1xf32> to vector<1x1x1xf32>
      %217 = vector.extract %216[0, 0, 0] : f32 from vector<1x1x1xf32>
      %cst_103 = arith.constant 0.000000e+00 : f32
      %218 = vector.broadcast %217 : f32 to vector<8x128xf32>
      %219 = vector.broadcast %cst_103 : f32 to vector<8x128xf32>
      %220 = arith.select %212, %218, %219 : vector<8x128xi1>, vector<8x128xf32>
      %221 = arith.addf %210, %220 : vector<8x128xf32>
      %c2_i32 = arith.constant 2 : i32
      %222 = vector.broadcast %c2_i32 : i32 to vector<8x128xi32>
      %223 = arith.cmpi eq, %198, %222 : vector<8x128xi32>
      %c0_104 = arith.constant 0 : index
      %c0_105 = arith.constant 0 : index
      %224 = vector.load %arg11[%c0_104, %c0_105] : memref<8x256xf32, #tpu.memory_space<vmem>>, vector<8x256xf32>
      %225 = vector.shape_cast %224 : vector<8x256xf32> to vector<1x8x256xf32>
      %cst_106 = arith.constant dense<0.000000e+00> : vector<1xf32>
      %226 = vector.multi_reduction <add>, %225, %cst_106 [1, 2] : vector<1x8x256xf32> to vector<1xf32>
      %227 = vector.shape_cast %226 : vector<1xf32> to vector<1x1x1xf32>
      %228 = vector.extract %227[0, 0, 0] : f32 from vector<1x1x1xf32>
      %cst_107 = arith.constant 0.000000e+00 : f32
      %229 = vector.broadcast %228 : f32 to vector<8x128xf32>
      %230 = vector.broadcast %cst_107 : f32 to vector<8x128xf32>
      %231 = arith.select %223, %229, %230 : vector<8x128xi1>, vector<8x128xf32>
      %232 = arith.addf %221, %231 : vector<8x128xf32>
      %c3_i32 = arith.constant 3 : i32
      %233 = vector.broadcast %c3_i32 : i32 to vector<8x128xi32>
      %234 = arith.cmpi eq, %198, %233 : vector<8x128xi32>
      %c0_108 = arith.constant 0 : index
      %c0_109 = arith.constant 0 : index
      %235 = vector.load %arg12[%c0_108, %c0_109] : memref<8x256xf32, #tpu.memory_space<vmem>>, vector<8x256xf32>
      %236 = vector.shape_cast %235 : vector<8x256xf32> to vector<1x8x256xf32>
      %cst_110 = arith.constant dense<0.000000e+00> : vector<1xf32>
      %237 = vector.multi_reduction <add>, %236, %cst_110 [1, 2] : vector<1x8x256xf32> to vector<1xf32>
      %238 = vector.shape_cast %237 : vector<1xf32> to vector<1x1x1xf32>
      %239 = vector.extract %238[0, 0, 0] : f32 from vector<1x1x1xf32>
      %cst_111 = arith.constant 0.000000e+00 : f32
      %240 = vector.broadcast %239 : f32 to vector<8x128xf32>
      %241 = vector.broadcast %cst_111 : f32 to vector<8x128xf32>
      %242 = arith.select %234, %240, %241 : vector<8x128xi1>, vector<8x128xf32>
      %243 = arith.addf %232, %242 : vector<8x128xf32>
      %c4_i32 = arith.constant 4 : i32
      %244 = vector.broadcast %c4_i32 : i32 to vector<8x128xi32>
      %245 = arith.cmpi eq, %198, %244 : vector<8x128xi32>
      %c0_112 = arith.constant 0 : index
      %c0_113 = arith.constant 0 : index
      %246 = vector.load %arg13[%c0_112, %c0_113] : memref<8x256xf32, #tpu.memory_space<vmem>>, vector<8x256xf32>
      %247 = vector.shape_cast %246 : vector<8x256xf32> to vector<1x8x256xf32>
      %cst_114 = arith.constant dense<0.000000e+00> : vector<1xf32>
      %248 = vector.multi_reduction <add>, %247, %cst_114 [1, 2] : vector<1x8x256xf32> to vector<1xf32>
      %249 = vector.shape_cast %248 : vector<1xf32> to vector<1x1x1xf32>
      %250 = vector.extract %249[0, 0, 0] : f32 from vector<1x1x1xf32>
      %cst_115 = arith.constant 0.000000e+00 : f32
      %251 = vector.broadcast %250 : f32 to vector<8x128xf32>
      %252 = vector.broadcast %cst_115 : f32 to vector<8x128xf32>
      %253 = arith.select %245, %251, %252 : vector<8x128xi1>, vector<8x128xf32>
      %254 = arith.addf %243, %253 : vector<8x128xf32>
      %c5_i32 = arith.constant 5 : i32
      %255 = vector.broadcast %c5_i32 : i32 to vector<8x128xi32>
      %256 = arith.cmpi eq, %198, %255 : vector<8x128xi32>
      %c0_116 = arith.constant 0 : index
      %c0_117 = arith.constant 0 : index
      %257 = vector.load %arg14[%c0_116, %c0_117] : memref<8x256xf32, #tpu.memory_space<vmem>>, vector<8x256xf32>
      %258 = vector.shape_cast %257 : vector<8x256xf32> to vector<1x8x256xf32>
      %cst_118 = arith.constant dense<0.000000e+00> : vector<1xf32>
      %259 = vector.multi_reduction <add>, %258, %cst_118 [1, 2] : vector<1x8x256xf32> to vector<1xf32>
      %260 = vector.shape_cast %259 : vector<1xf32> to vector<1x1x1xf32>
      %261 = vector.extract %260[0, 0, 0] : f32 from vector<1x1x1xf32>
      %cst_119 = arith.constant 0.000000e+00 : f32
      %262 = vector.broadcast %261 : f32 to vector<8x128xf32>
      %263 = vector.broadcast %cst_119 : f32 to vector<8x128xf32>
      %264 = arith.select %256, %262, %263 : vector<8x128xi1>, vector<8x128xf32>
      %265 = arith.addf %254, %264 : vector<8x128xf32>
      %266 = vector.shape_cast %265 : vector<8x128xf32> to vector<1x8x128xf32>
      %c0_120 = arith.constant 0 : index
      %c0_121 = arith.constant 0 : index
      %c0_122 = arith.constant 0 : index
      %267 = vector.load %arg8[%c0_120, %c0_121, %c0_122] : memref<1x8x128xf32, #tpu.memory_space<vmem>>, vector<1x8x128xf32>
      tpu.vector_store %arg8[%c0_120, %c0_121, %c0_122], %266 {strides = array<i32>} : memref<1x8x128xf32, #tpu.memory_space<vmem>>, vector<1x8x128xf32>,
    } else {
    }
    return
  }
  func.func @transform_0(%arg0: i32, %arg1: i32) -> (i32, i32) {
    %c1_i32 = arith.constant 1 : i32
    %0 = arith.muli %arg0, %c1_i32 : i32
    %1 = arith.addi %0, %arg1 : i32
    %c0_i32 = arith.constant 0 : i32
    %c0_i32_0 = arith.constant 0 : i32
    return %1, %c0_i32 : i32, i32
  }
  func.func @transform_1(%arg0: i32, %arg1: i32) -> (i32, i32) {
    %c1_i32 = arith.constant 1 : i32
    %0 = arith.muli %arg0, %c1_i32 : i32
    %1 = arith.addi %0, %arg1 : i32
    %c0_i32 = arith.constant 0 : i32
    %c0_i32_0 = arith.constant 0 : i32
    return %1, %c0_i32 : i32, i32
  }
  func.func @transform_2(%arg0: i32, %arg1: i32) -> (i32, i32) {
    %c1_i32 = arith.constant 1 : i32
    %0 = arith.muli %arg0, %c1_i32 : i32
    %1 = arith.addi %0, %arg1 : i32
    %c0_i32 = arith.constant 0 : i32
    %c0_i32_0 = arith.constant 0 : i32
    return %1, %c0_i32 : i32, i32
  }
  func.func @transform_3(%arg0: i32, %arg1: i32) -> (i32, i32) {
    %c1_i32 = arith.constant 1 : i32
    %0 = arith.muli %arg0, %c1_i32 : i32
    %1 = arith.addi %0, %arg1 : i32
    %c0_i32 = arith.constant 0 : i32
    %c0_i32_0 = arith.constant 0 : i32
    return %1, %c0_i32 : i32, i32
  }
  func.func @transform_4(%arg0: i32, %arg1: i32) -> (i32, i32) {
    %c1_i32 = arith.constant 1 : i32
    %0 = arith.muli %arg0, %c1_i32 : i32
    %1 = arith.addi %0, %arg1 : i32
    %c0_i32 = arith.constant 0 : i32
    %c0_i32_0 = arith.constant 0 : i32
    return %1, %c0_i32 : i32, i32
  }
  func.func @transform_5(%arg0: i32, %arg1: i32) -> (i32, i32) {
    %c1_i32 = arith.constant 1 : i32
    %0 = arith.muli %arg0, %c1_i32 : i32
    %1 = arith.addi %0, %arg1 : i32
    %c0_i32 = arith.constant 0 : i32
    %c0_i32_0 = arith.constant 0 : i32
    return %1, %c0_i32 : i32, i32
  }
  func.func @transform_6(%arg0: i32, %arg1: i32) -> (i32, i32, i32) {
    %c0_i32 = arith.constant 0 : i32
    %c0_i32_0 = arith.constant 0 : i32
    %c0_i32_1 = arith.constant 0 : i32
    return %arg0, %c0_i32, %c0_i32_0 : i32, i32, i32
  }
}

</mosaic_0001>

<bundles_post_ra>
// kernel: tpu_custom_call.1
= control target key start
LH: loop header
LB: loop body
LE: loop exit
PB: predicated region body
PF: predicated region fallthrough
CT: control target
= control target key end

     0   :  { %11 = vsyncpa [#allocation9], 0  ;;  %s1194_s0 = inlined_call_operand.hbm [shape: f32[8,256], index: 0, kind: input, shape index: {}]   ;;  %s1195_s1 = inlined_call_operand.hbm [shape: f32[8,256], index: 1, kind: input, shape index: {}]   ;;  %s1196_s2 = inlined_call_operand.hbm [shape: f32[8,256], index: 2, kind: input, shape index: {}]   ;;  %s1197_s3 = inlined_call_operand.hbm [shape: f32[8,256], index: 3, kind: input, shape index: {}]   ;;  %s1198_s4 = inlined_call_operand.hbm [shape: f32[8,256], index: 4, kind: input, shape index: {}]   ;;  %s1199_s5 = inlined_call_operand.hbm [shape: f32[8,256], index: 5, kind: input, shape index: {}]   ;;  %s1200_s6 = inlined_call_operand.hbm [shape: f32[1,8,128], index: 6, kind: output, shape index: {}]  }
   0x1   :  { %12 = vsyncpa [#allocation12], 0 }
   0x2   :  { %13 = vsyncpa [#allocation15], 0 }
   0x3   :  { %14 = vsyncpa [#allocation18], 0  ;;  %s40_s23 = sshll.u32 %s1195_s1, 4  ;;  %s41_s23 = int_to_ptr.hbm [resolvable:$true] %s40_s23 }
   0x4   :  { %15 = vsyncpa [#allocation10], 0  ;;  %s874_s24 = smov [#allocation11]   ;;  %s70_s28 = sshll.u32 %s1197_s3, 4  ;;  %s71_s28 = int_to_ptr.hbm [resolvable:$true] %s70_s28 }
   0x5   :  { %s42_s25 = sshll.u32 %s874_s24, 4  ;;  %s875_s29 = smov [#allocation14]   ;;  %s43_s25 = int_to_ptr.vmem [resolvable:$true] %s42_s25 }
   0x6   :  { %45 = dma.hbm_to_vmem [thread:$0]  %s41_s23, 256, %s43_s25, [#allocation12]  }
   0x7   :  { %s72_s30 = sshll.u32 %s875_s29, 4  ;;  %s25_s9 = sshll.u32 %s1194_s0, 4  ;;  %s73_s30 = int_to_ptr.vmem [resolvable:$true] %s72_s30  ;;  %s26_s9 = int_to_ptr.hbm [resolvable:$true] %s25_s9 }
   0x8   :  { %75 = dma.hbm_to_vmem [thread:$0]  %s71_s28, 256, %s73_s30, [#allocation15]  }
   0x9   :  { %s55_s11 = sshll.u32 %s1196_s2, 4  ;;  %s876_s12 = smov [#allocation8]   ;;  %s56_s11 = int_to_ptr.hbm [resolvable:$true] %s55_s11 }
   0xa   :  { %s27_s13 = sshll.u32 %s876_s12, 4  ;;  %s877_s3 = smov [#allocation13]   ;;  %s28_s13 = int_to_ptr.vmem [resolvable:$true] %s27_s13 }
   0xb   :  { %30 = dma.hbm_to_vmem [thread:$0]  %s26_s9, 256, %s28_s13, [#allocation9]  }
   0xc   :  { %s57_s14 = sshll.u32 %s877_s3, 4  ;;  %s85_s17 = sshll.u32 %s1198_s4, 4  ;;  %s58_s14 = int_to_ptr.vmem [resolvable:$true] %s57_s14  ;;  %s86_s17 = int_to_ptr.hbm [resolvable:$true] %s85_s17 }
   0xd   :  { %60 = dma.hbm_to_vmem [thread:$0]  %s56_s11, 256, %s58_s14, [#allocation12]  }
   0xe   :  { %s100_s19 = sshll.u32 %s1199_s5, 4  ;;  %s878_s20 = smov [#allocation16]   ;;  %s101_s19 = int_to_ptr.hbm [resolvable:$true] %s100_s19 }
   0xf   :  { %s87_s2 = sshll.u32 %s878_s20, 4  ;;  %s879_s21 = smov [#allocation17]   ;;  %s88_s2 = int_to_ptr.vmem [resolvable:$true] %s87_s2 }
  0x10   :  { %90 = dma.hbm_to_vmem [thread:$0]  %s86_s17, 256, %s88_s2, [#allocation15]  }
  0x11   :  { %s102_s22 = sshll.u32 %s879_s21, 4  ;;  %s103_s22 = int_to_ptr.vmem [resolvable:$true] %s102_s22 }
  0x12   :  { %105 = dma.hbm_to_vmem [thread:$0]  %s101_s19, 256, %s103_s22, [#allocation18]  }
  0x13   :  { %864 = dma.done.wait [#allocation9], 256  }
  0x14   :  { %865 = vsyncadd [#allocation9], 4294967040 }
  0x15   :  { %866 = dma.done.wait [#allocation12], 512  }
  0x16   :  { %867 = vsyncadd [#allocation12], 4294966784 }
  0x17   :  { %868 = dma.done.wait [#allocation15], 512  }
  0x18   :  { %869 = vsyncadd [#allocation15], 4294966784 }
  0x19   :  { %870 = dma.done.wait [#allocation18], 256  }
  0x1a   :  { %871 = vsyncadd [#allocation18], 4294967040  ;;  %v935_v0 = vld [vmem:[#allocation17] sm:$0xff]  ;;  %v937_v1 = vld [vmem:[#allocation17 + $0x8] sm:$0xff]  ;;  %v880_v28 = vmov 0.0   ;;  %s881_s27 = smov [#allocation19]  }
  0x1b   :  { %v414_v2 = vand.u32 2147483647, %v935_v0  ;;  %v415_v3 = vand.u32 2147483647, %v937_v1  ;;  %v392_v4 = vld [vmem:[#allocation13] sm:$0xff]  ;;  %v393_v5 = vld [vmem:[#allocation13 + $0x8] sm:$0xff] }
  0x1c   :  { %v941_v8 = vld [vmem:[#allocation14] sm:$0xff]  ;;  %v943_v9 = vld [vmem:[#allocation14 + $0x8] sm:$0xff]  ;;  %v400_v10 = vsub.f32 1.0, %v392_v4  ;;  %v401_v11 = vsub.f32 1.0, %v393_v5  ;;  %v947_v16 = vld [vmem:[#allocation16] sm:$0xff]  ;;  %vm394_vm0 = vcmp.eq.f32.partialorder %v392_v4, 1.0 }
  0x1d   :  { %v416_v6 = vsub.f32 0.0, %v414_v2  ;;  %v417_v7 = vsub.f32 0.0, %v415_v3  ;;  %v174_v14 = vand.u32 2147483647, %v941_v8  ;;  %v175_v15 = vand.u32 2147483647, %v943_v9 }
  0x1e   :  { %v949_v17 = vld [vmem:[#allocation16 + $0x8] sm:$0xff]  ;;  %vm395_vm1 = vcmp.eq.f32.partialorder %v393_v5, 1.0  ;;  %v402_v20 = vmul.f32 %v400_v10, %v400_v10  ;;  %v951_v21 = vld [vmem:[#allocation8] sm:$0xff]  ;;  %v294_v23 = vand.u32 2147483647, %v947_v16  ;;  %v403_v25 = vmul.f32 %v401_v11, %v401_v11  ;;  %s619_s28 = sshll.u32 %s881_s27, 4  ;;  %s620_s28 = int_to_ptr.vmem [resolvable:$true] %s619_s28 }
  0x1f   :  { %v418_v12 = vmul.f32 1.442695, %v416_v6  ;;  %v420_v13 = vmul.f32 1.442695, %v417_v7  ;;  %v176_v18 = vsub.f32 0.0, %v174_v14  ;;  %v177_v19 = vsub.f32 0.0, %v175_v15 }
  0x20   :  { %v953_v22 = vld [vmem:[#allocation8 + $0x8] sm:$0xff]  ;;  %v295_v24 = vand.u32 2147483647, %v949_v17  ;;  %v958_v29 = vsel %vm394_vm0, 1.0, %v880_v28  ;;  %v468_v30 = vsub.f32 0.0, %v935_v0  ;;  %v962_v31 = vsel %vm395_vm1, 1.0, %v880_v28 }
  0x21   :  { %660 = vpow2.f32 %v418_v12  ;;  %v178_v26 = vmul.f32 1.442695, %v176_v18  ;;  %v180_v27 = vmul.f32 1.442695, %v177_v19  ;;  %v160_v32 = vsub.f32 1.0, %v951_v21  ;;  %s621_s7 = sshll.u32 %s1200_s6, 4  ;;  %s622_s7 = int_to_ptr.hbm [resolvable:$true] %s621_s7 }
  0x22   :  { %662 = vpow2.f32 %v420_v13  ;;  %v161_v33 = vsub.f32 1.0, %v953_v22  ;;  %v968_v35 = vmul.f32 %v402_v20, %v402_v20  ;;  %v469_v36 = vsub.f32 0.0, %v937_v1 }
  0x23   :  { %664 = vpow2.f32 %v178_v26  ;;  %v296_v37 = vsub.f32 0.0, %v294_v23  ;;  %v297_v38 = vsub.f32 0.0, %v295_v24  ;;  %v973_v40 = vmul.f32 %v403_v25, %v403_v25 }
  0x24   :  { %666 = vpow2.f32 %v180_v27  ;;  %v228_v42 = vsub.f32 0.0, %v941_v8  ;;  %v470_v44 = vmax.f32 %v468_v30, 0.0  ;;  %v480_v45 = vmax.f32 %v935_v0, 0.0 }
  0x25   :  { %v481_v46 = vmax.f32 %v937_v1, 0.0  ;;  %v162_v47 = vmul.f32 %v160_v32, %v160_v32  ;;  %v163_v48 = vmul.f32 %v161_v33, %v161_v33  ;;  %v229_v49 = vsub.f32 0.0, %v943_v9 }
  0x26   :  { %v471_v50 = vmax.f32 %v469_v36, 0.0  ;;  %v987_v51 = vmul.f32 1.442695, %v296_v37  ;;  %v989_v52 = vmul.f32 1.442695, %v297_v38  ;;  %v996_v56 = vmax.f32 %v228_v42, 0.0 }
  0x27   :  { %v966_v34 = vpop.eup %660  ;;  %v1006_v61 = vmul.f32 %v162_v47, %v162_v47  ;;  %v1008_v62 = vmul.f32 %v163_v48, %v163_v48  ;;  %v1010_v63 = vmax.f32 %v229_v49, 0.0  ;;  %v240_v2 = vmax.f32 %v941_v8, 0.0 }
  0x28   :  { %v971_v39 = vpop.eup %662  ;;  %v976_v41 = vadd.f32 1.0, %v966_v34  ;;  %v241_v4 = vmax.f32 %v943_v9, 0.0  ;;  %vm454_vm7 = vcmp.ge.f32.partialorder %v935_v0, 0.0  ;;  %vm455_vm10 = vcmp.ge.f32.partialorder %v937_v1, 0.0  ;;  %v1149_v1 = vld [vmem:[#allocation11] sm:$0xff] }
  0x29   :  { %v980_v43 = vadd.f32 1.0, %v971_v39  ;;  %v991_v53 = vpop.eup %664  ;;  %vm214_vm0 = vcmp.ge.f32.partialorder %v941_v8, 0.0 }
  0x2a   :  { %668 = vrcp.f32 %v976_v41  ;;  %v433_v54 = vand.u32 2147483647, %v976_v41  ;;  %v435_v55 = vand.u32 2147483648, %v976_v41  ;;  %v1002_v59 = vadd.f32 1.0, %v991_v53  ;;  %v1004_v60 = vpop.eup %666 }
  0x2b   :  { %670 = vrcp.f32 %v980_v43  ;;  %v448_v57 = vand.u32 2147483647, %v980_v43  ;;  %v450_v58 = vand.u32 2147483648, %v980_v43  ;;  %vm429_vm2 = vweird.f32 %v976_v41 }
  0x2c   :  { %672 = vlog2.f32 %v976_v41  ;;  %v1015_v3 = vadd.f32 1.0, %v1004_v60  ;;  %vm1019_vm3 = vcmp.eq.f32.partialorder %v433_v54, 8.507059e+37  ;;  %v436_v7 = vor.u32 1.1754944e-38, %v435_v55 }
  0x2d   :  { %674 = vlog2.f32 %v980_v43  ;;  %vm444_vm4 = vweird.f32 %v980_v43  ;;  %v195_v10 = vand.u32 2147483648, %v1002_v59  ;;  %vm1026_vm5 = vcmp.eq.f32.partialorder %v448_v57, 8.507059e+37 }
  0x2e   :  { %676 = vrcp.f32 %v1002_v59  ;;  %v451_v14 = vor.u32 1.1754944e-38, %v450_v58  ;;  %vm189_vm8 = vweird.f32 %v1002_v59  ;;  %v193_v19 = vand.u32 2147483647, %v1002_v59 }
  0x2f   :  { %678 = vrcp.f32 %v1015_v3  ;;  %v1037_v25 = vor.u32 1.1754944e-38, %v195_v10  ;;  %v208_v30 = vand.u32 2147483647, %v1015_v3  ;;  %v210_v32 = vand.u32 2147483648, %v1015_v3 }
  0x30   :  { %v669_v5 = vpop.eup %668  ;;  %680 = vlog2.f32 %v1002_v59  ;;  %vm204_vm11 = vweird.f32 %v1015_v3  ;;  %vm1056_vm13 = vcmp.eq.f32.partialorder %v193_v19, 8.507059e+37 }
  0x31   :  { %v671_v11 = vpop.eup %670  ;;  %v425_v12 = vmul.f32 %v669_v5, %v976_v41  ;;  %vm430_vm6 = vweird.f32 %v669_v5  ;;  %682 = vlog2.f32 %v1015_v3  ;;  %vm1082_vm1 = vcmp.eq.f32.partialorder %v208_v30, 8.507059e+37 }
  0x32   :  { %v673_v15 = vpop.eup %672  ;;  %v440_v18 = vmul.f32 %v671_v11, %v980_v43  ;;  %vm445_vm9 = vweird.f32 %v671_v11  ;;  %vm1048_vm12 = vmor %vm429_vm2, %vm430_vm6  ;;  %vm215_vm2 = vcmp.ge.f32.partialorder %v943_v9, 0.0  ;;  %684 = vpow2.f32 %v987_v51 }
  0x33   :  { %v675_v20 = vpop.eup %674  ;;  %v426_v23 = vsub.f32 1.0, %v425_v12  ;;  %v465_v24 = vmul.f32 0.6931472, %v673_v15  ;;  %vm1065_vm14 = vmor %vm444_vm4, %vm445_vm9  ;;  %686 = vpow2.f32 %v989_v52 }
  0x34   :  { %v441_v26 = vsub.f32 1.0, %v440_v18  ;;  %v467_v27 = vmul.f32 0.6931472, %v675_v20  ;;  %v1041_v33 = vpop.eup %676 }
  0x35   :  { %v427_v36 = vmul.f32 %v669_v5, %v426_v23  ;;  %v472_v37 = vadd.f32 %v470_v44, %v465_v24  ;;  %v482_v38 = vadd.f32 %v480_v45, %v465_v24  ;;  %v185_v44 = vmul.f32 %v1041_v33, %v1002_v59  ;;  %v1060_v54 = vpop.eup %678 }
  0x36   :  { %v442_v47 = vmul.f32 %v671_v11, %v441_v26  ;;  %v473_v48 = vadd.f32 %v471_v50, %v467_v27  ;;  %v483_v49 = vadd.f32 %v481_v46, %v467_v27  ;;  %vm190_vm15 = vweird.f32 %v1041_v33  ;;  %v681_v46 = vpop.eup %680 }
  0x37   :  { %v428_v55 = vadd.f32 %v669_v5, %v427_v36  ;;  %v474_v50 = vsub.f32 0.0, %v472_v37  ;;  %v484_v57 = vsub.f32 0.0, %v482_v38  ;;  %v186_v15 = vsub.f32 1.0, %v185_v44  ;;  %v683_v36 = vpop.eup %682 }
  0x38   :  { %v443_v58 = vadd.f32 %v671_v11, %v442_v47  ;;  %v475_v10 = vsub.f32 0.0, %v473_v48  ;;  %v485_v12 = vsub.f32 0.0, %v483_v49  ;;  %v200_v43 = vmul.f32 %v1060_v54, %v1015_v3 }
  0x39   :  { %v432_v18 = vsel %vm1048_vm12, %v669_v5, %v428_v55  ;;  %v476_v19 = vmax.f32 %v474_v50, -9.2103405  ;;  %v486_v20 = vmax.f32 %v484_v57, -9.2103405  ;;  %v187_v48 = vmul.f32 %v1041_v33, %v186_v15 }
  0x3a   :  { %v437_v23 = vsel %vm1019_vm3, %v436_v7, %v432_v18  ;;  %v447_v24 = vsel %vm1065_vm14, %v671_v11, %v443_v58  ;;  %v477_v26 = vmax.f32 %v475_v10, -9.2103405  ;;  %v487_v27 = vmax.f32 %v485_v12, -9.2103405  ;;  %vm1095_vm3 = vmor %vm189_vm8, %vm190_vm15 }
  0x3b   :  { %v452_v37 = vsel %vm1026_vm5, %v451_v14, %v447_v24  ;;  %v456_v5 = vmul.f32 %v966_v34, %v437_v23  ;;  %v478_v38 = vmin.f32 %v476_v19, -0.000100005  ;;  %v488_v7 = vmin.f32 %v486_v20, -0.000100005 }
  0x3c   :  { %v457_v47 = vmul.f32 %v971_v39, %v452_v37  ;;  %v479_v6 = vmin.f32 %v477_v26, -0.000100005  ;;  %v489_v13 = vmin.f32 %v487_v27, -0.000100005  ;;  %v201_v14 = vsub.f32 1.0, %v200_v43 }
  0x3d   :  { %v458_v11 = vsel %vm454_vm7, %v437_v23, %v456_v5  ;;  %vm205_vm4 = vweird.f32 %v1060_v54  ;;  %v188_v49 = vadd.f32 %v1041_v33, %v187_v48  ;;  %v225_v0 = vmul.f32 0.6931472, %v681_v46 }
  0x3e   :  { %v459_v39 = vsel %vm455_vm10, %v452_v37, %v457_v47  ;;  %v460_v30 = vmax.f32 %v458_v11, 0.0001  ;;  %vm154_vm5 = vcmp.eq.f32.partialorder %v951_v21, 1.0  ;;  %v202_v55 = vmul.f32 %v1060_v54, %v201_v14  ;;  %vm1110_vm6 = vmor %vm204_vm11, %vm205_vm4 }
  0x3f   :  { %v461_v44 = vmax.f32 %v459_v39, 0.0001  ;;  %v211_v59 = vor.u32 1.1754944e-38, %v210_v32  ;;  %v227_v41 = vmul.f32 0.6931472, %v683_v36  ;;  %v192_v57 = vsel %vm1095_vm3, %v1041_v33, %v188_v49 }
  0x40   :  { %v462_v50 = vmin.f32 %v460_v30, 0.9999  ;;  %v232_v46 = vadd.f32 %v996_v56, %v225_v0  ;;  %v242_v58 = vadd.f32 %v240_v2, %v225_v0  ;;  %vm155_vm7 = vcmp.eq.f32.partialorder %v953_v22, 1.0 }
  0x41   :  { %v463_v10 = vmin.f32 %v461_v44, 0.9999  ;;  %v197_v32 = vsel %vm1056_vm13, %v1037_v25, %v192_v57  ;;  %v203_v33 = vadd.f32 %v1060_v54, %v202_v55  ;;  %v233_v3 = vadd.f32 %v1010_v63, %v227_v41  ;;  %v1144_v44 = vpop.eup %684 }
  0x42   :  { %v490_v12 = vsub.f32 1.0, %v462_v50  ;;  %v498_v15 = vmul.f32 %v462_v50, %v462_v50  ;;  %v216_v18 = vmul.f32 %v991_v53, %v197_v32  ;;  %v234_v19 = vsub.f32 0.0, %v232_v46  ;;  %v1151_v46 = vld [vmem:[#allocation11 + $0x8] sm:$0xff] }
  0x43   :  { %v491_v56 = vsub.f32 1.0, %v463_v10  ;;  %v499_v20 = vmul.f32 %v463_v10, %v463_v10  ;;  %v207_v2 = vsel %vm1110_vm6, %v1060_v54, %v203_v33  ;;  %v235_v43 = vsub.f32 0.0, %v233_v3 }
  0x44   :  { %v492_v23 = vmul.f32 %v490_v12, %v490_v12  ;;  %v500_v24 = vmul.f32 %v498_v15, %v488_v7  ;;  %v212_v25 = vsel %vm1082_vm1, %v211_v59, %v207_v2  ;;  %v218_v63 = vsel %vm214_vm0, %v197_v32, %v216_v18  ;;  %v1165_v2 = vpop.eup %686 }
  0x45   :  { %v493_v45 = vmul.f32 %v491_v56, %v491_v56  ;;  %v501_v26 = vmul.f32 %v499_v20, %v489_v13  ;;  %v217_v53 = vmul.f32 %v1004_v60, %v212_v25  ;;  %v220_v27 = vmax.f32 %v218_v63, 0.0001 }
  0x46   :  { %v494_v36 = vmul.f32 %v492_v23, %v478_v38  ;;  %v502_v37 = vmul.f32 %v500_v24, %v968_v35  ;;  %v236_v5 = vmax.f32 %v234_v19, -9.2103405  ;;  %v237_v11 = vmax.f32 %v235_v43, -9.2103405 }
  0x47   :  { %v495_v54 = vmul.f32 %v493_v45, %v479_v6  ;;  %v503_v47 = vmul.f32 %v501_v26, %v973_v40  ;;  %v219_v42 = vsel %vm215_vm2, %v212_v25, %v217_v53  ;;  %v222_v7 = vmin.f32 %v220_v27, 0.9999 }
  0x48   :  { %v496_v8 = vmul.f32 %v958_v29, %v494_v36  ;;  %v221_v48 = vmax.f32 %v219_v42, 0.0001  ;;  %v238_v13 = vmin.f32 %v236_v5, -0.000100005  ;;  %v243_v35 = vadd.f32 %v241_v4, %v227_v41 }
  0x49   :  { %v497_v60 = vmul.f32 %v962_v31, %v495_v54  ;;  %v244_v38 = vsub.f32 0.0, %v242_v58  ;;  %v250_v34 = vsub.f32 1.0, %v222_v7  ;;  %v634_v40 = vsel %vm154_vm5, 1.0, %v880_v28 }
  0x4a   :  { %v504_v51 = vadd.f32 %v502_v37, %v496_v8  ;;  %v223_v6 = vmin.f32 %v221_v48, 0.9999  ;;  %v258_v14 = vmul.f32 %v222_v7, %v222_v7  ;;  %v245_v30 = vsub.f32 0.0, %v243_v35 }
  0x4b   :  { %v505_v39 = vadd.f32 %v503_v47, %v497_v60  ;;  %v246_v49 = vmax.f32 %v244_v38, -9.2103405  ;;  %v252_v0 = vmul.f32 %v250_v34, %v250_v34  ;;  %v635_v9 = vsel %vm155_vm7, 1.0, %v880_v28 }
  0x4c   :  { %v239_v4 = vmin.f32 %v237_v11, -0.000100005  ;;  %v251_v55 = vsub.f32 1.0, %v223_v6  ;;  %v259_v59 = vmul.f32 %v223_v6, %v223_v6  ;;  %v247_v50 = vmax.f32 %v245_v30, -9.2103405 }
  0x4d   :  { %v552_v41 = vadd.f32 %v505_v39, %v504_v51  ;;  %v248_v57 = vmin.f32 %v246_v49, -0.000100005  ;;  %v254_v21 = vmul.f32 %v252_v0, %v238_v13  ;;  %vm274_vm8 = vcmp.eq.f32.partialorder %v1149_v1, 1.0 }
  0x4e   :  { %v253_v58 = vmul.f32 %v251_v55, %v251_v55  ;;  %vm275_vm9 = vcmp.eq.f32.partialorder %v1151_v46, 1.0  ;;  %v249_v22 = vmin.f32 %v247_v50, -0.000100005  ;;  %v302_v33 = vadd.f32 1.0, %v1144_v44 }
  0x4f   :  { %553 = vadd.xlane.f32.xlu1 %v552_v41  ;;  %v256_v10 = vmul.f32 %v634_v40, %v254_v21  ;;  %v260_v32 = vmul.f32 %v258_v14, %v248_v57  ;;  %v1159_v19 = vsel %vm274_vm8, 1.0, %v880_v28  ;;  %v1162_v56 = vsel %vm275_vm9, 1.0, %v880_v28 }
  0x50   :  { %v255_v3 = vmul.f32 %v253_v58, %v239_v4  ;;  %v261_v12 = vmul.f32 %v259_v59, %v249_v22  ;;  %688 = vrcp.f32 %v302_v33  ;;  %v303_v23 = vadd.f32 1.0, %v1165_v2 }
  0x51   :  { %v262_v15 = vmul.f32 %v260_v32, %v1006_v61  ;;  %690 = vlog2.f32 %v302_v33  ;;  %v348_v24 = vsub.f32 0.0, %v947_v16  ;;  %v584_v61 = vadd.f32 %v1162_v56, %v1159_v19 }
  0x52   :  { %v257_v18 = vmul.f32 %v635_v9, %v255_v3  ;;  %v263_v52 = vmul.f32 %v261_v12, %v1008_v62  ;;  %v568_v25 = vadd.f32 %v635_v9, %v634_v40  ;;  %692 = vrcp.f32 %v303_v23 }
  0x53   :  { %v264_v20 = vadd.f32 %v262_v15, %v256_v10  ;;  %585 = vadd.xlane.f32.xlu2 %v584_v61  ;;  %694 = vlog2.f32 %v303_v23  ;;  %vm309_vm10 = vweird.f32 %v302_v33  ;;  %v315_v62 = vand.u32 2147483648, %v302_v33 }
  0x54   :  { %v265_v43 = vadd.f32 %v263_v52, %v257_v18  ;;  %v350_v26 = vmax.f32 %v348_v24, 0.0  ;;  %v360_v53 = vmax.f32 %v947_v16, 0.0  ;;  %v313_v37 = vand.u32 2147483647, %v302_v33 }
  0x55   :  { %v349_v5 = vsub.f32 0.0, %v949_v17  ;;  %v600_v47 = vadd.f32 %v962_v31, %v958_v29  ;;  %v316_v48 = vor.u32 1.1754944e-38, %v315_v62  ;;  %v361_v13 = vmax.f32 %v949_v17, 0.0 }
  0x56   :  { %v689_v63 = vpop.eup %688  ;;  %v520_v45 = vadd.f32 %v265_v43, %v264_v20  ;;  %vm314_vm13 = vcmp.eq.f32.partialorder %v313_v37, 8.507059e+37  ;;  %vm324_vm14 = vweird.f32 %v303_v23  ;;  %v328_v40 = vand.u32 2147483647, %v303_v23 }
  0x57   :  { %v305_v28 = vmul.f32 %v689_v63, %v302_v33  ;;  %569 = vadd.xlane.f32.xlu1 %v568_v25  ;;  %v691_v27 = vpop.eup %690  ;;  %vm310_vm11 = vweird.f32 %v689_v63  ;;  %v351_v51 = vmax.f32 %v349_v5, 0.0  ;;  %v330_v6 = vand.u32 2147483648, %v303_v23 }
  0x58   :  { %521 = vadd.xlane.f32.xlu0 %v520_v45  ;;  %v345_v54 = vmul.f32 0.6931472, %v691_v27  ;;  %v693_v7 = vpop.eup %692  ;;  %vm1175_vm12 = vmor %vm309_vm10, %vm310_vm11  ;;  %vm334_vm0 = vcmp.ge.f32.partialorder %v947_v16, 0.0  ;;  %v280_v55 = vsub.f32 1.0, %v1149_v1  ;;  %vm329_vm2 = vcmp.eq.f32.partialorder %v328_v40, 8.507059e+37 }
  0x59   :  { %v306_v36 = vsub.f32 1.0, %v305_v28  ;;  %v695_v35 = vpop.eup %694  ;;  %v320_v34 = vmul.f32 %v693_v7, %v303_v23  ;;  %vm325_vm15 = vweird.f32 %v693_v7  ;;  %v331_v59 = vor.u32 1.1754944e-38, %v330_v6 }
  0x5a   :  { %v352_v11 = vadd.f32 %v350_v26, %v345_v54  ;;  %v362_v60 = vadd.f32 %v360_v53, %v345_v54  ;;  %v347_v29 = vmul.f32 0.6931472, %v695_v35  ;;  %vm326_vm1 = vmor %vm324_vm14, %vm325_vm15  ;;  %v281_v16 = vsub.f32 1.0, %v1151_v46 }
  0x5b   :  { %v307_v42 = vmul.f32 %v689_v63, %v306_v36  ;;  %601 = vadd.xlane.f32.xlu2 %v600_v47  ;;  %v321_v14 = vsub.f32 1.0, %v320_v34  ;;  %vm335_vm3 = vcmp.ge.f32.partialorder %v949_v17, 0.0  ;;  %v282_v1 = vmul.f32 %v280_v55, %v280_v55 }
  0x5c   :  { %v354_v39 = vsub.f32 0.0, %v352_v11  ;;  %v363_v49 = vadd.f32 %v361_v13, %v347_v29  ;;  %v364_v0 = vsub.f32 0.0, %v362_v60  ;;  %v353_v41 = vadd.f32 %v351_v51, %v347_v29 }
  0x5d   :  { %v308_v38 = vadd.f32 %v689_v63, %v307_v42  ;;  %v322_v9 = vmul.f32 %v693_v7, %v321_v14  ;;  %v283_v24 = vmul.f32 %v281_v16, %v281_v16  ;;  %v284_v46 = vmul.f32 %v282_v1, %v282_v1 }
  0x5e   :  { %v356_v21 = vmax.f32 %v354_v39, -9.2103405  ;;  %v365_v22 = vsub.f32 0.0, %v363_v49  ;;  %v366_v10 = vmax.f32 %v364_v0, -9.2103405  ;;  %v355_v3 = vsub.f32 0.0, %v353_v41 }
  0x5f   :  { %v312_v31 = vsel %vm1175_vm12, %v689_v63, %v308_v38  ;;  %v323_v50 = vadd.f32 %v693_v7, %v322_v9  ;;  %v285_v26 = vmul.f32 %v283_v24, %v283_v24 }
  0x60   :  { %v317_v30 = vsel %vm314_vm13, %v316_v48, %v312_v31  ;;  %v358_v15 = vmin.f32 %v356_v21, -0.000100005  ;;  %v367_v52 = vmax.f32 %v365_v22, -9.2103405  ;;  %v368_v20 = vmin.f32 %v366_v10, -0.000100005 }
  0x61   :  { %v336_v4 = vmul.f32 %v1144_v44, %v317_v30  ;;  %v327_v32 = vsel %vm326_vm1, %v693_v7, %v323_v50  ;;  %v357_v25 = vmax.f32 %v355_v3, -9.2103405 }
  0x62   :  { %v332_v33 = vsel %vm329_vm2, %v331_v59, %v327_v32  ;;  %v369_v62 = vmin.f32 %v367_v52, -0.000100005 }
  0x63   :  { %v338_v57 = vsel %vm334_vm0, %v317_v30, %v336_v4  ;;  %v337_v12 = vmul.f32 %v1165_v2, %v332_v33  ;;  %v359_v53 = vmin.f32 %v357_v25, -0.000100005 }
  0x64   :  { %v340_v58 = vmax.f32 %v338_v57, 0.0001 }
  0x65   :  { %v339_v23 = vsel %vm335_vm3, %v332_v33, %v337_v12 }
  0x66   :  { %v342_v44 = vmin.f32 %v340_v58, 0.9999  ;;  %v341_v61 = vmax.f32 %v339_v23, 0.0001 }
  0x68   :  { %v370_v18 = vsub.f32 1.0, %v342_v44  ;;  %v378_v43 = vmul.f32 %v342_v44, %v342_v44  ;;  %v343_v45 = vmin.f32 %v341_v61, 0.9999  ;;  %v515_v61 = vlaneseq }
  0x6a   :  { %v372_v63 = vmul.f32 %v370_v18, %v370_v18  ;;  %v380_v17 = vmul.f32 %v378_v43, %v368_v20  ;;  %v371_v27 = vsub.f32 1.0, %v343_v45  ;;  %v379_v36 = vmul.f32 %v343_v45, %v343_v45 }
  0x6b   :  { %v516_v25 = vand.u32 127, %v515_v61 }
  0x6c   :  { %v374_v28 = vmul.f32 %v372_v63, %v358_v15  ;;  %v373_v2 = vmul.f32 %v371_v27, %v371_v27  ;;  %v381_v5 = vmul.f32 %v379_v36, %v369_v62  ;;  %v382_v54 = vmul.f32 %v380_v17, %v284_v46 }
  0x6d   :  { %vm517_vm4 = vcmp.eq.s32.totalorder %v516_v25, 0  ;;  %vm533_vm5 = vcmp.eq.s32.totalorder %v516_v25, 1  ;;  %vm549_vm6 = vcmp.eq.s32.totalorder %v516_v25, 2  ;;  %vm565_vm7 = vcmp.eq.s32.totalorder %v516_v25, 3 }
  0x6e   :  { %v376_v37 = vmul.f32 %v1159_v19, %v374_v28  ;;  %v375_v47 = vmul.f32 %v373_v2, %v359_v53  ;;  %v383_v42 = vmul.f32 %v381_v5, %v285_v26  ;;  %vm581_vm8 = vcmp.eq.s32.totalorder %v516_v25, 4 }
  0x6f   :  { %vm597_vm9 = vcmp.eq.s32.totalorder %v516_v25, 5 }
  0x70   :  { %v377_v7 = vmul.f32 %v1162_v56, %v375_v47  ;;  %v384_v8 = vadd.f32 %v382_v54, %v376_v37 }
  0x72   :  { %v385_v48 = vadd.f32 %v383_v42, %v377_v7 }
  0x74   :  { %v536_v11 = vadd.f32 %v385_v48, %v384_v8 }
  0x76   :  { %537 = vadd.xlane.f32.xlu0 %v536_v11 }
  0xc2   :  { %v554_v6 = vpop.xlane.xlu1 %553 }
  0xc3   :  { %v555_v39 = vrot.slane %v554_v6, 4 }
  0xc5   :  { %v556_v0 = vadd.f32 %v555_v39, %v554_v6 }
  0xc6   :  { %v586_v19 = vpop.xlane.xlu2 %585 }
  0xc7   :  { %v587_v56 = vrot.slane %v586_v19, 4  ;;  %v557_v59 = vrot.slane %v556_v0, 2 }
  0xc9   :  { %v588_v4 = vadd.f32 %v587_v56, %v586_v19  ;;  %v558_v10 = vadd.f32 %v557_v59, %v556_v0 }
  0xca   :  { %v570_v29 = vpop.xlane.xlu1 %569 }
  0xcb   :  { %v522_v13 = vpop.xlane.xlu0 %521  ;;  %v571_v14 = vrot.slane %v570_v29, 4  ;;  %v589_v21 = vrot.slane %v588_v4, 2  ;;  %v559_v1 = vrot.slane %v558_v10, 1 }
  0xcc   :  { %v523_v60 = vrot.slane %v522_v13, 4 }
  0xcd   :  { %v572_v49 = vadd.f32 %v571_v14, %v570_v29  ;;  %v590_v33 = vadd.f32 %v589_v21, %v588_v4  ;;  %v560_v43 = vadd.f32 %v559_v1, %v558_v10 }
  0xce   :  { %v524_v35 = vadd.f32 %v523_v60, %v522_v13  ;;  %v602_v31 = vpop.xlane.xlu2 %601 }
  0xcf   :  { %v603_v30 = vrot.slane %v602_v31, 4  ;;  %v573_v55 = vrot.slane %v572_v49, 2  ;;  %v591_v18 = vrot.slane %v590_v33, 1 }
  0xd0   :  { %v525_v38 = vrot.slane %v524_v35, 2 }
  0xd1   :  { %v604_v9 = vadd.f32 %v603_v30, %v602_v31  ;;  %v574_v58 = vadd.f32 %v573_v55, %v572_v49  ;;  %v592_v24 = vadd.f32 %v591_v18, %v590_v33 }
  0xd2   :  { %v526_v34 = vadd.f32 %v525_v38, %v524_v35 }
  0xd3   :  { %v605_v57 = vrot.slane %v604_v9, 2  ;;  %v575_v3 = vrot.slane %v574_v58, 1 }
  0xd4   :  { %v527_v51 = vrot.slane %v526_v34, 1 }
  0xd5   :  { %v606_v32 = vadd.f32 %v605_v57, %v604_v9  ;;  %v576_v20 = vadd.f32 %v575_v3, %v574_v58 }
  0xd6   :  { %v528_v40 = vadd.f32 %v527_v51, %v526_v34 }
  0xd7   :  { %v607_v15 = vrot.slane %v606_v32, 1 }
  0xd8   :  { %640 = vpush %v528_v40 }
  0xd9   :  { %v608_v23 = vadd.f32 %v607_v15, %v606_v32 }
  0xe9   :  { %v538_v41 = vpop.xlane.xlu0 %537 }
  0xea   :  { %v539_v50 = vrot.slane %v538_v41, 4 }
  0xec   :  { %v540_v22 = vadd.f32 %v539_v50, %v538_v41 }
  0xee   :  { %v541_v16 = vrot.slane %v540_v22, 2 }
  0xf0   :  { %v542_v44 = vadd.f32 %v541_v16, %v540_v22 }
  0xf2   :  { %v543_v12 = vrot.slane %v542_v44, 1 }
  0xf4   :  { %v544_v52 = vadd.f32 %v543_v12, %v542_v44 }
  0xf6   :  { %642 = vpush %v544_v52 }
  0xf7   :  { %644 = vpush %v560_v43 }
  0xf8   :  { %646 = vpush %v576_v20 }
  0xf9   :  { %648 = vpush %v592_v24 }
  0xfa   :  { %650 = vpush %v608_v23 }
 0x109   :  { %s641_s4 = spop %640 }
 0x10a   :  { %v530_v63 = vstv %s641_s4 }
 0x10b   :  { %v531_v45 = vsel %vm517_vm4, %v530_v63, 0.0 }
 0x127   :  { %s643_s5 = spop %642 }
 0x128   :  { %v546_v46 = vstv %s643_s5  ;;  %s645_s23 = spop %644 }
 0x129   :  { %v547_v28 = vsel %vm533_vm5, %v546_v46, 0.0  ;;  %v562_v62 = vstv %s645_s23  ;;  %s647_s24 = spop %646 }
 0x12a   :  { %v548_v17 = vadd.f32 %v547_v28, %v531_v45  ;;  %v578_v26 = vstv %s647_s24  ;;  %s649_s25 = spop %648  ;;  %v563_v53 = vsel %vm549_vm6, %v562_v62, 0.0 }
 0x12b   :  { %s651_s26 = spop %650  ;;  %v594_v36 = vstv %s649_s25  ;;  %v579_v2 = vsel %vm565_vm7, %v578_v26, 0.0 }
 0x12c   :  { %v564_v27 = vadd.f32 %v563_v53, %v548_v17  ;;  %v610_v5 = vstv %s651_s26  ;;  %v595_v54 = vsel %vm581_vm8, %v594_v36, 0.0 }
 0x12d   :  { %v611_v42 = vsel %vm597_vm9, %v610_v5, 0.0 }
 0x12e   :  { %v580_v37 = vadd.f32 %v579_v2, %v564_v27 }
 0x130   :  { %v596_v47 = vadd.f32 %v595_v54, %v580_v37 }
 0x132   :  { %v612_v7 = vadd.f32 %v611_v42, %v596_v47 }
 0x134   :  { %613 = vst [vmem:[#allocation19] sm:$0xff] %v612_v7 }
 0x135   :  { %624 = dma.vmem_to_hbm [thread:$0]  %s620_s28, 128, %s622_s7, [#allocation10]  }
 0x136   :  { %872 = dma.done.wait [#allocation10], 128  }
 0x137   :  { %873 = vsyncadd [#allocation10], 4294967168 }
 0x138   :  { %629 = vsyncpa [#allocation9], 1 }
 0x139   :  { %630 = vsyncpa [#allocation12], 1 }
 0x13a   :  { %631 = vsyncpa [#allocation15], 1 }
 0x13b   :  { %632 = vsyncpa [#allocation18], 1 }
 0x13c   :  { %633 = vsyncpa [#allocation10], 1 }

</bundles_post_ra>
